<compile_context>
chip_gen: v5e
topology: v5e:2x2
jax: 0.10.0
libtpu: 0.0.40
codegen_flags: <defaults>
</compile_context>

<pallas_src>
import jax
import jax.numpy as jnp
from jax.experimental import pallas as pl
from jax.experimental.pallas import tpu as pltpu


def _round_up(x, m):
    return (x + m - 1) // m * m


def _choose_tile(dim, tmax, align):
    """Largest aligned tile <= tmax that minimizes padded waste for `dim`."""
    tmax = max(align, tmax // align * align)
    dim_a = _round_up(dim, align)
    if dim_a <= tmax:
        return dim_a
    nblk = -(-dim_a // tmax)                  # blocks needed at the max tile
    return _round_up(-(-dim_a // nblk), align)


# Contract the last dim of x (K) with the last dim of weight (K):  (tm,tk)x(tn,tk)->(tm,tn)
_DN = (((1,), (1,)), ((), ()))


def _mm_kernel(x_ref, w_ref, o_ref, acc_ref):
    """acc[i,j] += x[i,k] . w[j,k]; cast to output dtype at the last k step."""
    k = pl.program_id(2)

    @pl.when(k == 0)
    def _():
        acc_ref[...] = jnp.zeros_like(acc_ref)

    acc_ref[...] += jax.lax.dot_general(
        x_ref[...], w_ref[...], _DN, preferred_element_type=jnp.float32)

    @pl.when(k == pl.num_programs(2) - 1)
    def _():
        o_ref[...] = acc_ref[...].astype(o_ref.dtype)


def _mm_bias_kernel(x_ref, w_ref, b_ref, o_ref, acc_ref):
    """Same as _mm_kernel but adds the (f32) bias once in the epilogue."""
    k = pl.program_id(2)

    @pl.when(k == 0)
    def _():
        acc_ref[...] = jnp.zeros_like(acc_ref)

    acc_ref[...] += jax.lax.dot_general(
        x_ref[...], w_ref[...], _DN, preferred_element_type=jnp.float32)

    @pl.when(k == pl.num_programs(2) - 1)
    def _():
        o_ref[...] = (acc_ref[...] + b_ref[...]).astype(o_ref.dtype)


def _mm_kernel_1k(x_ref, w_ref, o_ref):
    """grid_k == 1 fast path: no scratch accumulator round-trip."""
    o_ref[...] = jax.lax.dot_general(
        x_ref[...], w_ref[...], _DN,
        preferred_element_type=jnp.float32).astype(o_ref.dtype)


def _mm_bias_kernel_1k(x_ref, w_ref, b_ref, o_ref):
    acc = jax.lax.dot_general(
        x_ref[...], w_ref[...], _DN, preferred_element_type=jnp.float32)
    o_ref[...] = (acc + b_ref[...]).astype(o_ref.dtype)


def row_parallel_linear(x, weight, bias=None, *, tm=256, tn=512, tk=1024):
    """y = x @ weight.T (+ bias); weight is (out_features, in_features)."""
    N, K = weight.shape
    lead = x.shape[:-1]
    x2 = x.reshape(-1, K)
    M = x2.shape[0]

    # Tile sizes: aligned to (8, 128) minima, clamped / waste-minimized.
    tm = _choose_tile(M, tm, 8)
    tn = _choose_tile(N, tn, 128)
    tk = _choose_tile(K, tk, 128)

    # Pad only when a tile does not divide the dim (zeros in K contribute
    # nothing; extra M rows / N cols are sliced off at the end).
    Mp, Np, Kp = _round_up(M, tm), _round_up(N, tn), _round_up(K, tk)
    if (Mp, Kp) != (M, K):
        x2 = jnp.pad(x2, ((0, Mp - M), (0, Kp - K)))
    w = weight
    if (Np, Kp) != (N, K):
        w = jnp.pad(w, ((0, Np - N), (0, Kp - K)))

    gm, gn, gk = Mp // tm, Np // tn, Kp // tk
    grid = (gm, gn, gk)

    x_b = x2.dtype.itemsize
    w_b = w.dtype.itemsize
    o_b = jnp.dtype(x.dtype).itemsize

    in_specs = [
        pl.BlockSpec((tm, tk), lambda i, j, k: (i, k)),   # activation tile (M, K)
        pl.BlockSpec((tn, tk), lambda i, j, k: (j, k)),   # weight tile, native (N, K)
    ]
    operands = [x2, w]

    if bias is not None:
        b2 = bias.reshape(1, N).astype(jnp.float32)
        if Np != N:
            b2 = jnp.pad(b2, ((0, 0), (0, Np - N)))
        in_specs.append(pl.BlockSpec((1, tn), lambda i, j, k: (0, j)))
        operands.append(b2)
        kernel = _mm_bias_kernel_1k if gk == 1 else _mm_bias_kernel
    else:
        kernel = _mm_kernel_1k if gk == 1 else _mm_kernel

    scratch_shapes = [] if gk == 1 else [pltpu.VMEM((tm, tn), jnp.float32)]

    # VMEM budget: double-buffered operand/output tiles + f32 accumulator.
    vmem_need = 2 * (tm * tk * x_b + tn * tk * w_b + tm * tn * o_b) + tm * tn * 4
    if bias is not None:
        vmem_need += 2 * tn * 4
    vmem_limit = int(min(max(2 * vmem_need, 32 << 20), 64 << 20))

    cost = pl.CostEstimate(
        flops=2 * Mp * Np * Kp,
        transcendentals=0,
        bytes_accessed=(Mp * Kp * x_b * gn      # x re-streamed per j block
                        + Np * Kp * w_b * gm    # weight re-streamed per i block
                        + Mp * Np * o_b),       # output written once
    )

    out = pl.pallas_call(
        kernel,
        out_shape=jax.ShapeDtypeStruct((Mp, Np), x.dtype),
        grid_spec=pltpu.PrefetchScalarGridSpec(
            num_scalar_prefetch=0,
            grid=grid,
            in_specs=in_specs,
            out_specs=pl.BlockSpec((tm, tn), lambda i, j, k: (i, j)),
            scratch_shapes=scratch_shapes,
        ),
        compiler_params=pltpu.CompilerParams(
            dimension_semantics=("parallel", "parallel", "arbitrary"),
            vmem_limit_bytes=vmem_limit,
        ),
        cost_estimate=cost,
    )(*operands)

    # world_size == 1: dist.all_reduce(y) is a no-op.
    # TODO(synk): world_size > 1 would need a ring all-reduce built from
    # pltpu.make_async_remote_copy + semaphores; not needed for this demo.
    out = out[:M, :N]
    return out.reshape(*lead, N)


if __name__ == "__main__":
    # Small shapes consistent with the module; seq=7 exercises the M-padding path.
    batch, seq = 2, 7
    in_features, out_features = 256, 384

    key = jax.random.PRNGKey(0)
    kx, kw, kb = jax.random.split(key, 3)

    weight = (0.02 * jax.random.normal(kw, (out_features, in_features))).astype(jnp.bfloat16)
    bias = jax.random.normal(kb, (out_features,)).astype(jnp.float32)
    x = jax.random.normal(kx, (batch, seq, in_features)).astype(jnp.bfloat16)

    fwd = jax.jit(row_parallel_linear)

    # Bias variant.
    y = jax.block_until_ready(fwd(x, weight, bias))
    ref = jnp.dot(x.astype(jnp.float32), weight.astype(jnp.float32).T) + bias
    ref = ref.astype(jnp.bfloat16)
    assert y.shape == (batch, seq, out_features)
    assert y.dtype == jnp.bfloat16
    assert jnp.allclose(y.astype(jnp.float32), ref.astype(jnp.float32),
                        atol=2e-2, rtol=2e-2), "mismatch vs reference (bias)"

    # No-bias variant (RowParallelLinear's default bias=False path).
    y0 = jax.block_until_ready(fwd(x, weight))
    ref0 = jnp.dot(x.astype(jnp.float32),
                   weight.astype(jnp.float32).T).astype(jnp.bfloat16)
    assert jnp.allclose(y0.astype(jnp.float32), ref0.astype(jnp.float32),
                        atol=2e-2, rtol=2e-2), "mismatch vs reference (no bias)"

    # Multi-K-tile path (exercises the f32 scratch accumulator kernels).
    y1 = jax.block_until_ready(
        jax.jit(lambda a, w, b: row_parallel_linear(a, w, b, tk=128))(x, weight, bias))
    assert jnp.allclose(y1.astype(jnp.float32), ref.astype(jnp.float32),
                        atol=2e-2, rtol=2e-2), "mismatch vs reference (multi-k)"

    print("KERNEL_OK")
</pallas_src>

<mosaic_0001>
module attributes {stable_mosaic.version = 11 : i64} {
  func.func @_mm_bias_kernel_1k(%arg0: i32, %arg1: i32, %arg2: i32, %arg3: memref<16x256xbf16, #tpu.memory_space<vmem>>, %arg4: memref<384x256xbf16, #tpu.memory_space<vmem>>, %arg5: memref<1x384xf32, #tpu.memory_space<vmem>>, %arg6: memref<16x384xbf16, #tpu.memory_space<vmem>>) attributes {dimension_semantics = [#tpu.dimension_semantics<parallel>, #tpu.dimension_semantics<parallel>, #tpu.dimension_semantics<arbitrary>], iteration_bounds = array<i64: 1, 1, 1>, scalar_prefetch = 0 : i64, scratch_operands = 0 : i64, tpu.core_type = #tpu.core_type<tc>, window_params = [{transform_indices = @transform_0, window_bounds = array<i64: 16, 256>}, {transform_indices = @transform_1, window_bounds = array<i64: 384, 256>}, {transform_indices = @transform_2, window_bounds = array<i64: 1, 384>}, {transform_indices = @transform_3, window_bounds = array<i64: 16, 384>}]} {
    %c0 = arith.constant 0 : index
    %c0_0 = arith.constant 0 : index
    %0 = vector.load %arg3[%c0, %c0_0] : memref<16x256xbf16, #tpu.memory_space<vmem>>, vector<16x256xbf16>
    %c0_1 = arith.constant 0 : index
    %c0_2 = arith.constant 0 : index
    %1 = vector.load %arg4[%c0_1, %c0_2] : memref<384x256xbf16, #tpu.memory_space<vmem>>, vector<384x256xbf16>
    %cst = arith.constant dense<0.000000e+00> : vector<16x384xf32>
    %2 = tpu.matmul %0, %1, %cst {dimension_numbers = #tpu.dot_dimension_numbers<[1], [1], [0], [0], [0, 0, 1, 0], [], []>} : vector<16x256xbf16>, vector<384x256xbf16>, vector<16x384xf32> -> vector<16x384xf32>
    %c0_3 = arith.constant 0 : index
    %c0_4 = arith.constant 0 : index
    %3 = vector.load %arg5[%c0_3, %c0_4] : memref<1x384xf32, #tpu.memory_space<vmem>>, vector<1x384xf32>
    %4 = vector.broadcast %3 : vector<1x384xf32> to vector<16x384xf32>
    %5 = arith.addf %2, %4 : vector<16x384xf32>
    %6 = arith.truncf %5 : vector<16x384xf32> to vector<16x384xbf16>
    %c0_5 = arith.constant 0 : index
    %c0_6 = arith.constant 0 : index
    %7 = vector.load %arg6[%c0_5, %c0_6] : memref<16x384xbf16, #tpu.memory_space<vmem>>, vector<16x384xbf16>
    tpu.vector_store %arg6[%c0_5, %c0_6], %6 {strides = array<i32>} : memref<16x384xbf16, #tpu.memory_space<vmem>>, vector<16x384xbf16>,
    return
  }
  func.func @transform_0(%arg0: i32, %arg1: i32, %arg2: i32) -> (i32, i32) {
    %c0_i32 = arith.constant 0 : i32
    return %arg0, %arg2 : i32, i32
  }
  func.func @transform_1(%arg0: i32, %arg1: i32, %arg2: i32) -> (i32, i32) {
    %c0_i32 = arith.constant 0 : i32
    return %arg1, %arg2 : i32, i32
  }
  func.func @transform_2(%arg0: i32, %arg1: i32, %arg2: i32) -> (i32, i32) {
    %c0_i32 = arith.constant 0 : i32
    %c0_i32_0 = arith.constant 0 : i32
    return %c0_i32, %arg1 : i32, i32
  }
  func.func @transform_3(%arg0: i32, %arg1: i32, %arg2: i32) -> (i32, i32) {
    %c0_i32 = arith.constant 0 : i32
    return %arg0, %arg1 : i32, i32
  }
}

</mosaic_0001>

<bundles_post_ra>
// kernel: row_parallel_linear.1
= control target key start
LH: loop header
LB: loop body
LE: loop exit
PB: predicated region body
PF: predicated region fallthrough
CT: control target
= control target key end

     0   :  { %8 = vsyncpa [#allocation3], 0  ;;  %s714_s15 = smov [#allocation2]   ;;  %s715_s17 = smov 128   ;;  %s767_s0 = inlined_call_operand.vmem [shape: bf16[16,256], index: 0, kind: input, shape index: {}]   ;;  %s768_s1 = inlined_call_operand.hbm [shape: bf16[384,256], index: 1, kind: input, shape index: {}]   ;;  %s769_s2 = inlined_call_operand.vmem [shape: f32[1,384], index: 2, kind: input, shape index: {}]   ;;  %s770_s3 = inlined_call_operand.vmem [shape: bf16[16,384], index: 3, kind: output, shape index: {}]  }
   0x1   :  { %s15_s14 = sshll.u32 %s768_s1, 4  ;;  %s17_s16 = sshll.u32 %s714_s15, 4  ;;  %s16_s14 = int_to_ptr.hbm [resolvable:$true] %s15_s14  ;;  %s18_s16 = int_to_ptr.vmem [resolvable:$true] %s17_s16 }
   0x2   :  { %s716_s18 = smov 8  }
   0x3   :  { %23 = dma.hbm_to_vmem [thread:$0]  %s16_s14, 6144, %s18_s16, [#allocation3], %s715_s17, %s715_s17, %s716_s18  }
   0x4   :  { %712 = dma.done.wait [#allocation3], 6144  }
   0x5   :  { %713 = vsyncadd [#allocation3], 4294961152  ;;  %v501_v0 = vld [vmem:[#allocation2 + $0x70] sm:$0xf]  ;;  %v652_v1 = vld [vmem:[#allocation2 + $0x74] sm:$0xf0] }
   0x6   :  { %v651_v2 = vld [vmem:[#allocation2 + $0x74] sm:$0xf]  ;;  %v502_v3 = vor.u32 %v652_v1, %v501_v0  ;;  %v503_v4 = vld [vmem:[#allocation2 + $0x78] sm:$0xf0]  ;;  %v493_v6 = vld [vmem:[#allocation2 + $0x60] sm:$0xf] }
   0x7   :  { %v506_v5 = vor.u32 %v651_v2, %v503_v4  ;;  %v650_v7 = vld [vmem:[#allocation2 + $0x64] sm:$0xf0]  ;;  %v649_v8 = vld [vmem:[#allocation2 + $0x64] sm:$0xf]  ;;  %v495_v9 = vld [vmem:[#allocation2 + $0x68] sm:$0xf0] }
   0x8   :  { %338 = vmatpush.bf16.xpose.msra.mxu0 %v502_v3  ;;  %v565_v10 = vld [vmem:[#allocation2 + $0xf0] sm:$0xf]  ;;  %v668_v11 = vld [vmem:[#allocation2 + $0xf4] sm:$0xf0]  ;;  %v667_v13 = vld [vmem:[#allocation2 + $0xf4] sm:$0xf]  ;;  %v494_v15 = vor.u32 %v650_v7, %v493_v6  ;;  %v498_v17 = vor.u32 %v649_v8, %v495_v9 }
   0x9   :  { %352 = vmatpush.bf16.xpose.msra.mxu1 %v506_v5  ;;  %v566_v12 = vor.u32 %v668_v11, %v565_v10  ;;  %v567_v14 = vld [vmem:[#allocation2 + $0xf8] sm:$0xf0]  ;;  %v557_v18 = vld [vmem:[#allocation2 + $0xe0] sm:$0xf]  ;;  %v666_v19 = vld [vmem:[#allocation2 + $0xe4] sm:$0xf0] }
   0xa   :  { %v570_v16 = vor.u32 %v667_v13, %v567_v14  ;;  %v665_v20 = vld [vmem:[#allocation2 + $0xe4] sm:$0xf]  ;;  %v559_v21 = vld [vmem:[#allocation2 + $0xe8] sm:$0xf0]  ;;  %v485_v22 = vld [vmem:[#allocation2 + $0x50] sm:$0xf]  ;;  %v558_v24 = vor.u32 %v666_v19, %v557_v18 }
   0xb   :  { %366 = vmatpush.bf16.xpose.msra.mxu2 %v566_v12  ;;  %v648_v23 = vld [vmem:[#allocation2 + $0x54] sm:$0xf0]  ;;  %v647_v25 = vld [vmem:[#allocation2 + $0x54] sm:$0xf]  ;;  %v487_v26 = vld [vmem:[#allocation2 + $0x58] sm:$0xf0]  ;;  %v562_v27 = vor.u32 %v665_v20, %v559_v21 }
   0xc   :  { %380 = vmatpush.bf16.xpose.msra.mxu3 %v570_v16  ;;  %v486_v28 = vor.u32 %v648_v23, %v485_v22  ;;  %v490_v29 = vor.u32 %v647_v25, %v487_v26  ;;  %v549_v30 = vld [vmem:[#allocation2 + $0xd0] sm:$0xf]  ;;  %v664_v31 = vld [vmem:[#allocation2 + $0xd4] sm:$0xf0]  ;;  %v663_v32 = vld [vmem:[#allocation2 + $0xd4] sm:$0xf] }
   0xd   :  { %v551_v33 = vld [vmem:[#allocation2 + $0xd8] sm:$0xf0]  ;;  %v477_v34 = vld [vmem:[#allocation2 + $0x40] sm:$0xf]  ;;  %v646_v35 = vld [vmem:[#allocation2 + $0x44] sm:$0xf0]  ;;  %v550_v36 = vor.u32 %v664_v31, %v549_v30 }
   0xe   :  { %v645_v37 = vld [vmem:[#allocation2 + $0x44] sm:$0xf]  ;;  %v479_v38 = vld [vmem:[#allocation2 + $0x48] sm:$0xf0]  ;;  %v554_v39 = vor.u32 %v663_v32, %v551_v33  ;;  %v478_v40 = vor.u32 %v646_v35, %v477_v34  ;;  %v541_v42 = vld [vmem:[#allocation2 + $0xc0] sm:$0xf] }
   0xf   :  { %v482_v41 = vor.u32 %v645_v37, %v479_v38  ;;  %v662_v43 = vld [vmem:[#allocation2 + $0xc4] sm:$0xf0]  ;;  %v661_v44 = vld [vmem:[#allocation2 + $0xc4] sm:$0xf]  ;;  %v543_v45 = vld [vmem:[#allocation2 + $0xc8] sm:$0xf0] }
  0x10   :  { %339 = vmatpush.bf16.xpose.msra.mxu0 %v494_v15  ;;  %v469_v46 = vld [vmem:[#allocation2 + $0x30] sm:$0xf]  ;;  %v644_v47 = vld [vmem:[#allocation2 + $0x34] sm:$0xf0]  ;;  %v542_v48 = vor.u32 %v662_v43, %v541_v42  ;;  %v643_v49 = vld [vmem:[#allocation2 + $0x34] sm:$0xf]  ;;  %v546_v51 = vor.u32 %v661_v44, %v543_v45 }
  0x11   :  { %353 = vmatpush.bf16.xpose.msra.mxu1 %v498_v17  ;;  %v471_v50 = vld [vmem:[#allocation2 + $0x38] sm:$0xf0]  ;;  %v470_v52 = vor.u32 %v644_v47, %v469_v46  ;;  %v533_v54 = vld [vmem:[#allocation2 + $0xb0] sm:$0xf]  ;;  %v660_v55 = vld [vmem:[#allocation2 + $0xb4] sm:$0xf0] }
  0x12   :  { %v474_v53 = vor.u32 %v643_v49, %v471_v50  ;;  %v659_v56 = vld [vmem:[#allocation2 + $0xb4] sm:$0xf]  ;;  %v535_v57 = vld [vmem:[#allocation2 + $0xb8] sm:$0xf0]  ;;  %v461_v58 = vld [vmem:[#allocation2 + $0x20] sm:$0xf]  ;;  %v534_v60 = vor.u32 %v660_v55, %v533_v54 }
  0x13   :  { %367 = vmatpush.bf16.xpose.msra.mxu2 %v558_v24  ;;  %v642_v59 = vld [vmem:[#allocation2 + $0x24] sm:$0xf0]  ;;  %v641_v61 = vld [vmem:[#allocation2 + $0x24] sm:$0xf]  ;;  %v463_v62 = vld [vmem:[#allocation2 + $0x28] sm:$0xf0]  ;;  %v538_v63 = vor.u32 %v659_v56, %v535_v57 }
  0x14   :  { %381 = vmatpush.bf16.xpose.msra.mxu3 %v562_v27  ;;  %v462_v0 = vor.u32 %v642_v59, %v461_v58  ;;  %v466_v1 = vor.u32 %v641_v61, %v463_v62  ;;  %v525_v2 = vld [vmem:[#allocation2 + $0xa0] sm:$0xf]  ;;  %v658_v3 = vld [vmem:[#allocation2 + $0xa4] sm:$0xf0]  ;;  %v657_v4 = vld [vmem:[#allocation2 + $0xa4] sm:$0xf] }
  0x15   :  { %v527_v5 = vld [vmem:[#allocation2 + $0xa8] sm:$0xf0]  ;;  %v453_v6 = vld [vmem:[#allocation2 + $0x10] sm:$0xf]  ;;  %v640_v7 = vld [vmem:[#allocation2 + $0x14] sm:$0xf0]  ;;  %v526_v8 = vor.u32 %v658_v3, %v525_v2 }
  0x16   :  { %v639_v9 = vld [vmem:[#allocation2 + $0x14] sm:$0xf]  ;;  %v455_v10 = vld [vmem:[#allocation2 + $0x18] sm:$0xf0]  ;;  %v530_v11 = vor.u32 %v657_v4, %v527_v5  ;;  %v454_v12 = vor.u32 %v640_v7, %v453_v6  ;;  %v517_v14 = vld [vmem:[#allocation2 + $0x90] sm:$0xf] }
  0x17   :  { %v458_v13 = vor.u32 %v639_v9, %v455_v10  ;;  %v656_v15 = vld [vmem:[#allocation2 + $0x94] sm:$0xf0]  ;;  %v655_v16 = vld [vmem:[#allocation2 + $0x94] sm:$0xf]  ;;  %v519_v17 = vld [vmem:[#allocation2 + $0x98] sm:$0xf0] }
  0x18   :  { %340 = vmatpush.bf16.xpose.msra.mxu0 %v486_v28  ;;  %v445_v18 = vld [vmem:[#allocation2] sm:$0xf]  ;;  %v638_v19 = vld [vmem:[#allocation2 + $0x4] sm:$0xf0]  ;;  %v637_v20 = vld [vmem:[#allocation2 + $0x4] sm:$0xf]  ;;  %v518_v21 = vor.u32 %v656_v15, %v517_v14  ;;  %v522_v25 = vor.u32 %v655_v16, %v519_v17 }
  0x19   :  { %354 = vmatpush.bf16.xpose.msra.mxu1 %v490_v29  ;;  %v447_v22 = vld [vmem:[#allocation2 + $0x8] sm:$0xf0]  ;;  %v629_v23 = vld [vmem:[#allocation2 + $0x170] sm:$0xf]  ;;  %v684_v24 = vld [vmem:[#allocation2 + $0x174] sm:$0xf0]  ;;  %v446_v28 = vor.u32 %v638_v19, %v445_v18 }
  0x1a   :  { %v683_v26 = vld [vmem:[#allocation2 + $0x174] sm:$0xf]  ;;  %v631_v27 = vld [vmem:[#allocation2 + $0x178] sm:$0xf0]  ;;  %v450_v29 = vor.u32 %v637_v20, %v447_v22  ;;  %v630_v30 = vor.u32 %v684_v24, %v629_v23  ;;  %v509_v32 = vld [vmem:[#allocation2 + $0x80] sm:$0xf] }
  0x1b   :  { %368 = vmatpush.bf16.xpose.msra.mxu2 %v550_v36  ;;  %v634_v31 = vor.u32 %v683_v26, %v631_v27  ;;  %v654_v33 = vld [vmem:[#allocation2 + $0x84] sm:$0xf0]  ;;  %v653_v34 = vld [vmem:[#allocation2 + $0x84] sm:$0xf]  ;;  %v511_v35 = vld [vmem:[#allocation2 + $0x88] sm:$0xf0] }
  0x1c   :  { %382 = vmatpush.bf16.xpose.msra.mxu3 %v554_v39  ;;  %v621_v36 = vld [vmem:[#allocation2 + $0x160] sm:$0xf]  ;;  %v682_v37 = vld [vmem:[#allocation2 + $0x164] sm:$0xf0]  ;;  %v510_v38 = vor.u32 %v654_v33, %v509_v32  ;;  %v681_v39 = vld [vmem:[#allocation2 + $0x164] sm:$0xf] }
  0x1d   :  { %v636_v42 = vld [vmem:[%s767_s0 + $0x4] sm:$0xf0]  ;;  %v623_v43 = vld [vmem:[#allocation2 + $0x168] sm:$0xf0]  ;;  %v635_v44 = vld [vmem:[%s767_s0 + $0x4] sm:$0xf]  ;;  %v622_v46 = vor.u32 %v682_v37, %v621_v36 }
  0x1e   :  { %v439_v45 = vld [vmem:[%s767_s0 + $0x8] sm:$0xf0]  ;;  %v613_v50 = vld [vmem:[#allocation2 + $0x150] sm:$0xf]  ;;  %v605_v56 = vld [vmem:[#allocation2 + $0x140] sm:$0xf] }
  0x1f   :  { %v442_v49 = vor.u32 %v635_v44, %v439_v45  ;;  %v678_v57 = vld [vmem:[#allocation2 + $0x144] sm:$0xf0]  ;;  %v677_v58 = vld [vmem:[#allocation2 + $0x144] sm:$0xf]  ;;  %v607_v59 = vld [vmem:[#allocation2 + $0x148] sm:$0xf0] }
  0x20   :  { %341 = vmatpush.bf16.xpose.msra.mxu0 %v478_v40  ;;  %v514_v40 = vor.u32 %v653_v34, %v511_v35  ;;  %v610_v61 = vor.u32 %v677_v58, %v607_v59  ;;  %v597_v62 = vld [vmem:[#allocation2 + $0x130] sm:$0xf]  ;;  %v589_v4 = vld [vmem:[#allocation2 + $0x120] sm:$0xf]  ;;  %v674_v5 = vld [vmem:[#allocation2 + $0x124] sm:$0xf0] }
  0x21   :  { %355 = vmatpush.bf16.xpose.msra.mxu1 %v482_v41  ;;  %v437_v41 = vld [vmem:[%s767_s0] sm:$0xf]  ;;  %v673_v6 = vld [vmem:[#allocation2 + $0x124] sm:$0xf]  ;;  %v591_v7 = vld [vmem:[#allocation2 + $0x128] sm:$0xf0] }
  0x22   :  { %v438_v47 = vor.u32 %v636_v42, %v437_v41  ;;  %v594_v9 = vor.u32 %v673_v6, %v591_v7  ;;  %v581_v10 = vld [vmem:[#allocation2 + $0x110] sm:$0xf]  ;;  %v573_v16 = vld [vmem:[#allocation2 + $0x100] sm:$0xf]  ;;  %v670_v17 = vld [vmem:[#allocation2 + $0x104] sm:$0xf0] }
  0x23   :  { %369 = vmatpush.bf16.xpose.msra.mxu2 %v542_v48  ;;  %v626_v48 = vor.u32 %v681_v39, %v623_v43  ;;  %v669_v18 = vld [vmem:[#allocation2 + $0x104] sm:$0xf]  ;;  %v575_v19 = vld [vmem:[#allocation2 + $0x108] sm:$0xf0]  ;;  %v574_v20 = vor.u32 %v670_v17, %v573_v16  ;;  %v80_v22 = vld [vmem:[%s769_s2] sm:$0x7] }
  0x24   :  { %383 = vmatpush.bf16.xpose.msra.mxu3 %v546_v51  ;;  %v680_v51 = vld [vmem:[#allocation2 + $0x154] sm:$0xf0]  ;;  %v82_v24 = vperm.slane %v80_v22, 0  ;;  %v83_v27 = vperm.slane %v80_v22, 1  ;;  %v84_v43 = vperm.slane %v80_v22, 2 }
  0x25   :  { %v614_v54 = vor.u32 %v680_v51, %v613_v50 }
  0x28   :  { %342 = vmatpush.bf16.xpose.msra.mxu0 %v470_v52  ;;  %v679_v52 = vld [vmem:[#allocation2 + $0x154] sm:$0xf] }
  0x29   :  { %356 = vmatpush.bf16.xpose.msra.mxu1 %v474_v53  ;;  %v615_v53 = vld [vmem:[#allocation2 + $0x158] sm:$0xf0] }
  0x2a   :  { %v618_v55 = vor.u32 %v679_v52, %v615_v53 }
  0x2b   :  { %370 = vmatpush.bf16.xpose.msra.mxu2 %v534_v60  ;;  %v606_v60 = vor.u32 %v678_v57, %v605_v56 }
  0x2c   :  { %384 = vmatpush.bf16.xpose.msra.mxu3 %v538_v63  ;;  %v676_v63 = vld [vmem:[#allocation2 + $0x134] sm:$0xf0] }
  0x2d   :  { %v598_v2 = vor.u32 %v676_v63, %v597_v62 }
  0x30   :  { %343 = vmatpush.bf16.xpose.msra.mxu0 %v462_v0  ;;  %v675_v0 = vld [vmem:[#allocation2 + $0x134] sm:$0xf] }
  0x31   :  { %357 = vmatpush.bf16.xpose.msra.mxu1 %v466_v1  ;;  %v599_v1 = vld [vmem:[#allocation2 + $0x138] sm:$0xf0] }
  0x32   :  { %v602_v3 = vor.u32 %v675_v0, %v599_v1 }
  0x33   :  { %371 = vmatpush.bf16.xpose.msra.mxu2 %v526_v8  ;;  %v590_v8 = vor.u32 %v674_v5, %v589_v4 }
  0x34   :  { %385 = vmatpush.bf16.xpose.msra.mxu3 %v530_v11  ;;  %v672_v11 = vld [vmem:[#allocation2 + $0x114] sm:$0xf0] }
  0x35   :  { %v582_v14 = vor.u32 %v672_v11, %v581_v10 }
  0x38   :  { %344 = vmatpush.bf16.xpose.msra.mxu0 %v454_v12  ;;  %v671_v12 = vld [vmem:[#allocation2 + $0x114] sm:$0xf] }
  0x39   :  { %358 = vmatpush.bf16.xpose.msra.mxu1 %v458_v13  ;;  %v583_v13 = vld [vmem:[#allocation2 + $0x118] sm:$0xf0] }
  0x3a   :  { %v586_v15 = vor.u32 %v671_v12, %v583_v13 }
  0x3b   :  { %372 = vmatpush.bf16.xpose.msra.mxu2 %v518_v21  ;;  %v578_v21 = vor.u32 %v669_v18, %v575_v19 }
  0x3c   :  { %386 = vmatpush.bf16.xpose.msra.mxu3 %v522_v25 }
  0x40   :  { %345 = vmatpush.bf16.xpose.msra.mxu0 %v446_v28 }
  0x41   :  { %359 = vmatpush.bf16.xpose.msra.mxu1 %v450_v29 }
  0x43   :  { %373 = vmatpush.bf16.xpose.msra.mxu2 %v510_v38 }
  0x44   :  { %387 = vmatpush.bf16.xpose.msra.mxu3 %v514_v40 }
  0x47   :  { %346 = vmatmul.bf16.vlgmr.msra.gmra.mxu0 %v438_v47 }
  0x48   :  { %394 = vmatpush.bf16.xpose.msrb.mxu0 %v630_v30  ;;  %360 = vmatmul.bf16.vlgmr.msra.gmra.mxu1 %v442_v49 }
  0x49   :  { %408 = vmatpush.bf16.xpose.msrb.mxu1 %v634_v31 }
  0x4a   :  { %374 = vmatmul.bf16.vlgmr.msra.gmra.mxu2 %v438_v47 }
  0x4b   :  { %388 = vmatmul.bf16.vlgmr.msra.gmra.mxu3 %v442_v49 }
  0x50   :  { %395 = vmatpush.bf16.xpose.msrb.mxu0 %v622_v46 }
  0x51   :  { %409 = vmatpush.bf16.xpose.msrb.mxu1 %v626_v48 }
  0x58   :  { %396 = vmatpush.bf16.xpose.msrb.mxu0 %v614_v54 }
  0x59   :  { %410 = vmatpush.bf16.xpose.msrb.mxu1 %v618_v55 }
  0x60   :  { %397 = vmatpush.bf16.xpose.msrb.mxu0 %v606_v60 }
  0x61   :  { %411 = vmatpush.bf16.xpose.msrb.mxu1 %v610_v61 }
  0x68   :  { %398 = vmatpush.bf16.xpose.msrb.mxu0 %v598_v2 }
  0x69   :  { %412 = vmatpush.bf16.xpose.msrb.mxu1 %v602_v3 }
  0x70   :  { %399 = vmatpush.bf16.xpose.msrb.mxu0 %v590_v8 }
  0x71   :  { %413 = vmatpush.bf16.xpose.msrb.mxu1 %v594_v9 }
  0x78   :  { %400 = vmatpush.bf16.xpose.msrb.mxu0 %v582_v14 }
  0x79   :  { %414 = vmatpush.bf16.xpose.msrb.mxu1 %v586_v15 }
  0x80   :  { %401 = vmatpush.bf16.xpose.msrb.mxu0 %v574_v20 }
  0x81   :  { %415 = vmatpush.bf16.xpose.msrb.mxu1 %v578_v21 }
  0x87   :  { %402 = vmatmul.bf16.vlgmr.msrb.gmra.mxu0 %v438_v47 }
  0x88   :  { %416 = vmatmul.bf16.vlgmr.msrb.gmra.mxu1 %v442_v49 }
  0xc4   :  { %v347_v23 = vpop.f32.mrf.mxu0 }
  0xc5   :  { %v361_v25 = vpop.f32.mrf.mxu1  ;;  %v348_v26 = vadd.f32 %v347_v23, %v82_v24 }
  0xc7   :  { %v362_v30 = vadd.f32 %v361_v25, %v348_v26 }
  0xcc   :  { %v349_v32 = vpop.f32.mrf.mxu0 }
  0xcd   :  { %v375_v28 = vpop.f32.mrf.mxu2  ;;  %v350_v35 = vadd.f32 %v349_v32, %v82_v24  ;;  %v363_v36 = vpop.f32.mrf.mxu1 }
  0xce   :  { %v376_v29 = vadd.f32 %v375_v28, %v83_v27  ;;  %v389_v31 = vpop.f32.mrf.mxu3 }
  0xcf   :  { %v364_v39 = vadd.f32 %v363_v36, %v350_v35 }
  0xd0   :  { %v390_v33 = vadd.f32 %v389_v31, %v376_v29 }
  0xd2   :  { %v422_v34 = vpack.c.bf16 %v390_v33, %v362_v30 }
  0xd4   :  { %426 = vst [vmem:[%s770_s3] sm:$0xff] %v422_v34 }
  0xd5   :  { %v377_v37 = vpop.f32.mrf.mxu2 }
  0xd6   :  { %v378_v38 = vadd.f32 %v377_v37, %v83_v27  ;;  %v391_v40 = vpop.f32.mrf.mxu3 }
  0xd8   :  { %v392_v41 = vadd.f32 %v391_v40, %v378_v38 }
  0xda   :  { %v424_v42 = vpack.c.bf16 %v392_v41, %v364_v39 }
  0xdc   :  { %428 = vst [vmem:[%s770_s3 + $0xc] sm:$0xff] %v424_v42 }
 0x104   :  { %v403_v44 = vpop.f32.mrf.mxu0 }
 0x105   :  { %v404_v45 = vadd.f32 %v403_v44, %v84_v43  ;;  %v417_v46 = vpop.f32.mrf.mxu1 }
 0x107   :  { %v418_v47 = vadd.f32 %v417_v46, %v404_v45 }
 0x109   :  { %v423_v48 = vpack.c.bf16 %v418_v47, %v418_v47 }
 0x10b   :  { %427 = vst [vmem:[%s770_s3 + $0x8] sm:$0xf] %v423_v48 }
 0x10c   :  { %v405_v49 = vpop.f32.mrf.mxu0 }
 0x10d   :  { %v406_v50 = vadd.f32 %v405_v49, %v84_v43  ;;  %v419_v51 = vpop.f32.mrf.mxu1 }
 0x10f   :  { %v420_v52 = vadd.f32 %v419_v51, %v406_v50 }
 0x111   :  { %v425_v53 = vpack.c.bf16 %v420_v52, %v420_v52 }
 0x113   :  { %429 = vst [vmem:[%s770_s3 + $0x14] sm:$0xf] %v425_v53 }
 0x114   :  { %434 = vsyncpa [#allocation3], 1 }

</bundles_post_ra>
